<compile_context>
chip_gen: v6e
topology: v6e:2x2x1
jax: 0.10.0
libtpu: 0.0.40
codegen_flags: <defaults>
</compile_context>

<pallas_src>
import jax
import jax.numpy as jnp
from jax.experimental import pallas as pl
from jax.experimental.pallas import tpu as pltpu


# ---------------------------------------------------------------------------
# permutation coalescing
# ---------------------------------------------------------------------------
def _coalesce(shape, perm):
    """Merge input axes that remain adjacent and in-order in the output.

    Returns (coalesced_input_shape, coalesced_perm).
    """
    groups = []  # runs of consecutive input axes, listed in output order
    for p in perm:
        if groups and p == groups[-1][-1] + 1:
            groups[-1].append(p)
        else:
            groups.append([p])

    order = sorted(range(len(groups)), key=lambda g: groups[g][0])  # input order
    new_shape = []
    group_to_new_axis = {}
    for new_axis, g in enumerate(order):
        group_to_new_axis[g] = new_axis
        size = 1
        for ax in groups[g]:
            size *= shape[ax]
        new_shape.append(size)
    new_perm = tuple(group_to_new_axis[g] for g in range(len(groups)))
    return tuple(new_shape), new_perm


# ---------------------------------------------------------------------------
# batched 2-D transpose kernel: (B, M, N) -> (B, N, M)
# ---------------------------------------------------------------------------
def _bt_kernel(x_ref, o_ref):
    # x_ref: (bt, tm, tn), o_ref: (bt, tn, tm) -- pure minor-two transpose (XLU)
    o_ref[...] = jnp.swapaxes(x_ref[...], 1, 2)


def _pick_tile(d, target=512):
    """Full dim if small / not 128-divisible, else a 128-multiple divisor."""
    if d <= target or d % 128 != 0:
        # TODO(synk): very large ragged dims (not multiples of 128) are not tiled.
        return d
    t = target
    while t >= 128:
        if d % t == 0:
            return t
        t -= 128
    return d


def _batched_transpose(x3, *, vmem_budget_bytes=4 * 1024 * 1024):
    """Pallas batched transpose: x3 (B, M, N) -> (B, N, M)."""
    B, M, N = x3.shape
    itemsize = x3.dtype.itemsize

    tm = _pick_tile(M)
    tn = _pick_tile(N)

    # Pack as many planes per grid step as the VMEM budget allows (in + out,
    # double-buffered by the pipeline), but keep >= 2 steps over the batch axis
    # when B >= 2 so both TensorCores (v7x) get work.
    plane_bytes = 2 * tm * tn * itemsize
    bt = max(1, min(B, vmem_budget_bytes // max(plane_bytes, 1)))
    if B >= 2:
        bt = min(bt, max(1, B // 2))
    while B % bt != 0:
        bt -= 1

    grid = (B // bt, M // tm, N // tn)

    return pl.pallas_call(
        _bt_kernel,
        out_shape=jax.ShapeDtypeStruct((B, N, M), x3.dtype),
        grid_spec=pltpu.PrefetchScalarGridSpec(
            num_scalar_prefetch=0,
            grid=grid,
            in_specs=[pl.BlockSpec((bt, tm, tn), lambda b, i, j: (b, i, j))],
            out_specs=pl.BlockSpec((bt, tn, tm), lambda b, i, j: (b, j, i)),
        ),
        compiler_params=pltpu.CompilerParams(
            dimension_semantics=("parallel", "parallel", "parallel")),
        cost_estimate=pl.CostEstimate(
            flops=0,
            transcendentals=0,
            bytes_accessed=2 * x3.size * itemsize),
    )(x3)


# ---------------------------------------------------------------------------
# public permute
# ---------------------------------------------------------------------------
def permute(x: jnp.ndarray, perm) -> jnp.ndarray:
    """Equivalent of input.permute(*perm).contiguous()."""
    ndim = x.ndim
    perm = tuple(int(p) % ndim for p in perm)
    assert sorted(perm) == list(range(ndim)), f"invalid permutation {perm}"

    out_shape = tuple(x.shape[p] for p in perm)

    # identity: already "contiguous" in JAX semantics
    if perm == tuple(range(ndim)):
        return x

    cshape, cperm = _coalesce(x.shape, perm)

    if len(cperm) == 2:  # pure 2-D transpose of the coalesced axes
        x3 = x.reshape((1,) + cshape)          # free metadata reshape
        out = _batched_transpose(x3)
        return out.reshape(out_shape)

    if len(cperm) == 3 and cperm == (0, 2, 1):  # batched 2-D transpose
        x3 = x.reshape(cshape)
        out = _batched_transpose(x3)
        return out.reshape(out_shape)

    # TODO(synk): exotic permutations (e.g. (1,0,2) / (2,1,0) after coalescing)
    # fall back to XLA's transpose; no dedicated Pallas kernel for them yet.
    return jnp.transpose(x, perm)


class PermutePallas:
    """Mirror of the PyTorch Permute module."""

    def __init__(self, shape):
        self.shape = tuple(shape)

    def __repr__(self):
        return f"Permute{self.shape}"

    def __call__(self, x):
        return permute(x, self.shape)


# ---------------------------------------------------------------------------
# demo / self-test
# ---------------------------------------------------------------------------
if __name__ == "__main__":
    key = jax.random.PRNGKey(0)
    x = jax.random.normal(key, (2, 4, 16, 16), dtype=jnp.float32)  # NCHW

    # NCHW -> NHWC (coalesces to a batched (B, C, H*W) -> (B, H*W, C) transpose)
    mod = PermutePallas((0, 2, 3, 1))
    out = jax.block_until_ready(mod(x))
    assert out.shape == (2, 16, 16, 4)
    assert jnp.array_equal(out, jnp.transpose(x, (0, 2, 3, 1)))

    # NHWC -> NCHW (the inverse; also hits the batched-transpose kernel)
    back = jax.block_until_ready(PermutePallas((0, 3, 1, 2))(out))
    assert back.shape == x.shape
    assert jnp.array_equal(back, x)

    # plain 2-D transpose on a (seq=8, hidden=32) matrix
    y = jax.random.normal(jax.random.PRNGKey(1), (8, 32), dtype=jnp.float32)
    t = jax.block_until_ready(PermutePallas((1, 0))(y))
    assert t.shape == (32, 8)
    assert jnp.array_equal(t, y.T)

    print("KERNEL_OK")
</pallas_src>

<mosaic_0001>
module attributes {stable_mosaic.version = 11 : i64} {
  func.func @_bt_kernel(%arg0: i32, %arg1: i32, %arg2: i32, %arg3: memref<1x4x256xf32, #tpu.memory_space<vmem>>, %arg4: memref<1x256x4xf32, #tpu.memory_space<vmem>>) attributes {dimension_semantics = [#tpu.dimension_semantics<parallel>, #tpu.dimension_semantics<parallel>, #tpu.dimension_semantics<parallel>], iteration_bounds = array<i64: 2, 1, 1>, scalar_prefetch = 0 : i64, scratch_operands = 0 : i64, tpu.core_type = #tpu.core_type<tc>, window_params = [{transform_indices = @transform_0, window_bounds = array<i64: 1, 4, 256>}, {transform_indices = @transform_1, window_bounds = array<i64: 1, 256, 4>}]} {
    %c0 = arith.constant 0 : index
    %c0_0 = arith.constant 0 : index
    %c0_1 = arith.constant 0 : index
    %0 = vector.load %arg3[%c0, %c0_0, %c0_1] : memref<1x4x256xf32, #tpu.memory_space<vmem>>, vector<1x4x256xf32>
    %1 = tpu.transpose %0, [0, 2, 1] : vector<1x4x256xf32> -> vector<1x256x4xf32>
    %c0_2 = arith.constant 0 : index
    %c0_3 = arith.constant 0 : index
    %c0_4 = arith.constant 0 : index
    %2 = vector.load %arg4[%c0_2, %c0_3, %c0_4] : memref<1x256x4xf32, #tpu.memory_space<vmem>>, vector<1x256x4xf32>
    tpu.vector_store %arg4[%c0_2, %c0_3, %c0_4], %1 {strides = array<i32>} : memref<1x256x4xf32, #tpu.memory_space<vmem>>, vector<1x256x4xf32>,
    return
  }
  func.func @transform_0(%arg0: i32, %arg1: i32, %arg2: i32) -> (i32, i32, i32) {
    %c0_i32 = arith.constant 0 : i32
    return %arg0, %arg1, %arg2 : i32, i32, i32
  }
  func.func @transform_1(%arg0: i32, %arg1: i32, %arg2: i32) -> (i32, i32, i32) {
    %c0_i32 = arith.constant 0 : i32
    return %arg0, %arg2, %arg1 : i32, i32, i32
  }
}

</mosaic_0001>

<bundles_post_ra>
// kernel: tpu_custom_call.1
= control target key start
LH: loop header
LB: loop body
LE: loop exit
PB: predicated region body
PF: predicated region fallthrough
CT: control target
= control target key end

     0   :  { %6 = vsyncpa [#allocation3], 0  ;;  %s722_s0 = inlined_call_operand.hbm [shape: f32[2,4,256], index: 0, kind: input, shape index: {}]   ;;  %s723_s1 = inlined_call_operand.vmem [shape: f32[2,256,4], index: 1, kind: output, shape index: {}]  }
   0x1   :  { %8 = vsyncpa [#allocation3 + $0x1], 0  ;;  %s556_s6 = smov 0   ;;  %s558_s7 = smov 0  }
   0x2   :  { %s560_s8 = smov 0   ;;  %s562_s9 = smov 0  }
   0x3   :  { %s564_s10 = smov 0   ;;  %s566_s11 = smov 0  }
   0x4 LB: > { %s393_s12 = sadd.s32 4294967295, %s543_s11   ;;  %s33_s13 = sadd.s32 1, %s539_s10  ;;  %s543_s11 = sphi %s566_s11, %s14_s11   ;;  %s539_s10 = sphi %s564_s10, %s731_s10   ;;  %s535_s9 = sphi %s562_s9, %s730_s9   ;;  %s531_s8 = sphi %s560_s8, %s729_s8   ;;  %s527_s7 = sphi %s558_s7, %s728_s7   ;;  %s523_s6 = sphi %s556_s6, %s727_s6  }
   0x5   : > { %p35_p0 = scmp.ge.s32.totalorder %s33_s13, 2  ;;  %s44_s14 = sadd.s32 1, %s531_s8 }
   0x6   : > { %p51_p1 = scmp.ne.s32.totalorder %s531_s8, %s527_s7  ;;  %p52_p2 = scmp.eq.s32.totalorder %s543_s11, 0 }
   0x7   : > { %s733_s13 = smov (%p35_p0, %s33_s13), 0  ;;  %p57_p4 = scmp.ne.s32.totalorder %s527_s7, %s523_s6 }
   0x8   : > { %p592_p3 = por %p52_p2, %p51_p1  ;;  %s37_s16 = ssub.s32 %s539_s10, %s733_s13 }
   0x9   : > { %p58_p5 = scmp.eq.s32.totalorder %s393_s12, 0  ;;  %p42_p6 = scmp.eq.s32.totalorder %s37_s16, 0 }
   0xa   : > { %p414_p8 = scmp.lt.s32.totalorder %s543_s11, 2  ;;  %s111_s19 = sand.u32 1, %s531_s8  }
   0xb   : > { %p599_p7 = por %p58_p5, %p57_p4  ;;  %s406_s20 = sshll.u32 %s539_s10, 7 }
   0xc   : > { %s605_s18 = scalar_select %p42_p6, %s531_s8, %s44_s14  }
   0xd   : > { %s397_s21 = sshll.u32 %s111_s19, 3  ;;  %s125_s24 = scalar_lea.hbm %s722_s0, %s406_s20 }
   0xe   : > { %s115_s25 = scalar_lea.vmem [#allocation2], %s397_s21  ;;  %p614_p9 = pnand %p414_p8, %p592_p3 }
   0xf   : > { %s127_s26 = sshll.u32 %s115_s25, 4  ;;  %p400_p10 = scmp.ge.s32.totalorder %s543_s11, 1  ;;  %s128_s26 = int_to_ptr.vmem [resolvable:$true] %s127_s26 }
  0x10   : > { %p132_p11 = scmp.lt.s32.totalorder %s543_s11, 3  ;;  %s112_s28 = scalar_lea.sflag [#allocation3], %s111_s19 }
  0x11   : > { %p467_p12 = pneg %p614_p9  ;;  %s478_s29 = scalar_lea.vmem %s128_s26, 128 }
  0x12   : > { %p479_p13 = scmp.ne.s32.totalorder %s128_s26, %s478_s29  ;;  %s545_s30 = smov [#allocation2]  }
  0x13   : > { %s483_s2 = sshll.u32 %s545_s30, 4  ;;  %s484_s2 = int_to_ptr.vmem [resolvable:$false] %s483_s2 }
  0x14   : > { %p481_p0 = pnand %p479_p13, %p467_p12  ;;  %s485_s3 = scalar_lea.vmem %s484_s2, 256 }
  0x15   : > { %p486_p2 = scmp.lt.s32.totalorder %s128_s26, %s484_s2  ;;  %p487_p3 = scmp.lt.s32.totalorder %s485_s3, %s478_s29 }
  0x16   : > { %p482_p1 = pneg %p481_p0 }
  0x17   : > { %p488_p4 = por %p487_p3, %p486_p2 }
  0x19   : > { %p489_p5 = pnand %p488_p4, %p482_p1 }
  0x1b   : > { %492 = shalt.err (!%p489_p5)
}
  0x1c   : > { %413 = dma.hbm_to_vmem [thread:$0]  (!%p614_p9), %s125_s24, 128, %s128_s26, %s112_s28  }
  0x1d   : > { %p133_p6 = pnand %p400_p10, %p132_p11 }
  0x1e   : > { %s138_s4 = sand.u32 (!%p133_p6), 1, %s527_s7  }
  0x1f   : > { %136 = sbr.rel (%p133_p6) target bundleno = 288 (0x120), region = 24  ;;  %s401_s5 = sshll.u32 (!%p133_p6), %s138_s4, 3 }
  0x20   : > { %s139_s6 = scalar_lea.sflag (!%p133_p6), [#allocation3], %s138_s4  ;;  %s142_s12 = scalar_lea.vmem (!%p133_p6), [#allocation2], %s401_s5 }
  0x24   : > { %518 = dma.done.wait (%p599_p7), %s139_s6, 128  }
  0x25   : > { %520 = vsyncadd (%p599_p7), %s139_s6, 4294967168  ;;  %v182_v0 = vld [vmem:[%s142_s12] sm:$0xff]  ;;  %p170_p8 = scmp.lt.s32.totalorder %s535_s9, 1  ;;  %vm250_vm0 = vcmask 31744  }
  0x26   : > { %186 = vxpose.xlu0.b32.start.end [1/1] (short) %v182_v0, 128  ;;  %v184_v1 = vcombine.high %v182_v0, %v182_v0 }
  0x27   : > { %s735_s9 = smov (!%p170_p8, %s535_s9), 1 }
  0x28   : > { %s407_s14 = sshll.u32 %s735_s9, 8 }
  0x29   : > { %s638_s19 = scalar_lea.vmem %s723_s1, %s407_s14 }
  0x63   : > { %218 = vxpose.xlu0.b32.start.end [1/1] (short) %v184_v1, 128 }
  0xa2   : > { %v202_v2 = vpop.trf.xlu0 }
  0xa3   : > { %251 = vst.msk [vmem:[%s638_s19] sm:$0xff] %vm250_vm0, %v202_v2 }
  0xa6   : > { %v203_v3 = vpop.trf.xlu0 }
  0xa7   : > { %252 = vst.msk [vmem:[%s638_s19 + $0x8] sm:$0xff] %vm250_vm0, %v203_v3 }
  0xaa   : > { %v204_v4 = vpop.trf.xlu0 }
  0xab   : > { %253 = vst.msk [vmem:[%s638_s19 + $0x10] sm:$0xff] %vm250_vm0, %v204_v4 }
  0xae   : > { %v205_v5 = vpop.trf.xlu0 }
  0xaf   : > { %254 = vst.msk [vmem:[%s638_s19 + $0x18] sm:$0xff] %vm250_vm0, %v205_v5 }
  0xb2   : > { %v206_v6 = vpop.trf.xlu0 }
  0xb3   : > { %255 = vst.msk [vmem:[%s638_s19 + $0x20] sm:$0xff] %vm250_vm0, %v206_v6 }
  0xb6   : > { %v207_v7 = vpop.trf.xlu0 }
  0xb7   : > { %256 = vst.msk [vmem:[%s638_s19 + $0x28] sm:$0xff] %vm250_vm0, %v207_v7 }
  0xba   : > { %v208_v8 = vpop.trf.xlu0 }
  0xbb   : > { %257 = vst.msk [vmem:[%s638_s19 + $0x30] sm:$0xff] %vm250_vm0, %v208_v8 }
  0xbe   : > { %v209_v9 = vpop.trf.xlu0 }
  0xbf   : > { %258 = vst.msk [vmem:[%s638_s19 + $0x38] sm:$0xff] %vm250_vm0, %v209_v9 }
  0xc2   : > { %v210_v10 = vpop.trf.xlu0 }
  0xc3   : > { %259 = vst.msk [vmem:[%s638_s19 + $0x40] sm:$0xff] %vm250_vm0, %v210_v10 }
  0xc6   : > { %v211_v11 = vpop.trf.xlu0 }
  0xc7   : > { %260 = vst.msk [vmem:[%s638_s19 + $0x48] sm:$0xff] %vm250_vm0, %v211_v11 }
  0xca   : > { %v212_v12 = vpop.trf.xlu0 }
  0xcb   : > { %261 = vst.msk [vmem:[%s638_s19 + $0x50] sm:$0xff] %vm250_vm0, %v212_v12 }
  0xce   : > { %v213_v13 = vpop.trf.xlu0 }
  0xcf   : > { %262 = vst.msk [vmem:[%s638_s19 + $0x58] sm:$0xff] %vm250_vm0, %v213_v13 }
  0xd2   : > { %v214_v14 = vpop.trf.xlu0 }
  0xd3   : > { %263 = vst.msk [vmem:[%s638_s19 + $0x60] sm:$0xff] %vm250_vm0, %v214_v14 }
  0xd6   : > { %v215_v15 = vpop.trf.xlu0 }
  0xd7   : > { %264 = vst.msk [vmem:[%s638_s19 + $0x68] sm:$0xff] %vm250_vm0, %v215_v15 }
  0xda   : > { %v216_v16 = vpop.trf.xlu0 }
  0xdb   : > { %265 = vst.msk [vmem:[%s638_s19 + $0x70] sm:$0xff] %vm250_vm0, %v216_v16 }
  0xde   : > { %v217_v17 = vpop.trf.xlu0 }
  0xdf   : > { %266 = vst.msk [vmem:[%s638_s19 + $0x78] sm:$0xff] %vm250_vm0, %v217_v17 }
  0xe2   : > { %v234_v18 = vpop.trf.xlu0 }
  0xe3   : > { %267 = vst.msk [vmem:[%s638_s19 + $0x80] sm:$0xff] %vm250_vm0, %v234_v18 }
  0xe6   : > { %v235_v19 = vpop.trf.xlu0 }
  0xe7   : > { %268 = vst.msk [vmem:[%s638_s19 + $0x88] sm:$0xff] %vm250_vm0, %v235_v19 }
  0xea   : > { %v236_v20 = vpop.trf.xlu0 }
  0xeb   : > { %269 = vst.msk [vmem:[%s638_s19 + $0x90] sm:$0xff] %vm250_vm0, %v236_v20 }
  0xee   : > { %v237_v21 = vpop.trf.xlu0 }
  0xef   : > { %270 = vst.msk [vmem:[%s638_s19 + $0x98] sm:$0xff] %vm250_vm0, %v237_v21 }
  0xf2   : > { %v238_v22 = vpop.trf.xlu0 }
  0xf3   : > { %271 = vst.msk [vmem:[%s638_s19 + $0xa0] sm:$0xff] %vm250_vm0, %v238_v22 }
  0xf6   : > { %v239_v23 = vpop.trf.xlu0 }
  0xf7   : > { %272 = vst.msk [vmem:[%s638_s19 + $0xa8] sm:$0xff] %vm250_vm0, %v239_v23 }
  0xfa   : > { %v240_v24 = vpop.trf.xlu0 }
  0xfb   : > { %273 = vst.msk [vmem:[%s638_s19 + $0xb0] sm:$0xff] %vm250_vm0, %v240_v24 }
  0xfe   : > { %v241_v25 = vpop.trf.xlu0 }
  0xff   : > { %274 = vst.msk [vmem:[%s638_s19 + $0xb8] sm:$0xff] %vm250_vm0, %v241_v25 }
 0x102   : > { %v242_v26 = vpop.trf.xlu0 }
 0x103   : > { %275 = vst.msk [vmem:[%s638_s19 + $0xc0] sm:$0xff] %vm250_vm0, %v242_v26 }
 0x106   : > { %v243_v27 = vpop.trf.xlu0 }
 0x107   : > { %276 = vst.msk [vmem:[%s638_s19 + $0xc8] sm:$0xff] %vm250_vm0, %v243_v27 }
 0x10a   : > { %v244_v28 = vpop.trf.xlu0 }
 0x10b   : > { %277 = vst.msk [vmem:[%s638_s19 + $0xd0] sm:$0xff] %vm250_vm0, %v244_v28 }
 0x10e   : > { %v245_v29 = vpop.trf.xlu0 }
 0x10f   : > { %278 = vst.msk [vmem:[%s638_s19 + $0xd8] sm:$0xff] %vm250_vm0, %v245_v29 }
 0x112   : > { %v246_v30 = vpop.trf.xlu0 }
 0x113   : > { %279 = vst.msk [vmem:[%s638_s19 + $0xe0] sm:$0xff] %vm250_vm0, %v246_v30 }
 0x116   : > { %v247_v31 = vpop.trf.xlu0 }
 0x117   : > { %280 = vst.msk [vmem:[%s638_s19 + $0xe8] sm:$0xff] %vm250_vm0, %v247_v31 }
 0x11a   : > { %v248_v32 = vpop.trf.xlu0 }
 0x11b   : > { %281 = vst.msk [vmem:[%s638_s19 + $0xf0] sm:$0xff] %vm250_vm0, %v248_v32 }
 0x11e   : > { %v249_v33 = vpop.trf.xlu0 }
 0x11f   : > { %282 = vst.msk [vmem:[%s638_s19 + $0xf8] sm:$0xff] %vm250_vm0, %v249_v33 }
 0x120 PF: > { %s14_s11 = sadd.s32 1, %s543_s11   ;;  %s727_s6 = smov %s527_s7 }
 0x121   : > { %p11_p7 = scmp.ge.s32.totalorder %s14_s11, 4   ;;  %s728_s7 = smov %s531_s8 }
 0x122   : > { %s729_s8 = smov %s605_s18  ;;  %s730_s9 = smov %s539_s10 }
 0x123   : > { %s731_s10 = smov %s733_s13  ;;  %13 = sbr.rel (!%p11_p7) target bundleno = 4 (0x4), region = 64 }
 0x128   :  { %319 = vsyncpa [#allocation3], 1 }
 0x129   :  { %321 = vsyncpa [#allocation3 + $0x1], 1 }

</bundles_post_ra>
